<compile_context>
chip_gen: v7x
topology: tpu7x:2x2x1
jax: 0.10.0
libtpu: 0.0.40
codegen_flags: <defaults>
</compile_context>

<pallas_src>
import jax
import jax.numpy as jnp
from jax.experimental import pallas as pl
from jax.experimental.pallas import tpu as pltpu


def _mish_kernel(x_ref, o_ref):
    # Compute in f32 regardless of storage dtype (v5e has no bf16 EUP path).
    x = x_ref[...].astype(jnp.float32)
    # mish(x) = x * tanh(softplus(x)) = x * u / (u + 2),  u = t*(t+2), t = e^x.
    # Clamp at 20: matches torch softplus threshold and avoids t*t overflow.
    t = jnp.exp(jnp.minimum(x, 20.0))
    u = t * (t + 2.0)
    # Exact reciprocal: after the single-exp rewrite the kernel is HBM-bound,
    # so the exact rcp (vs approx=True) costs nothing and keeps full fidelity.
    y = x * u * pl.reciprocal(u + 2.0)
    o_ref[...] = y.astype(o_ref.dtype)


def _pick_lane_width(n: int):
    """Widest lane-dense last dim (multiple of 128) that divides n exactly."""
    for lane in (4096, 2048, 1024, 512, 256, 128):
        if n % lane == 0:
            return lane
    return None


def mish(x: jax.Array) -> jax.Array:
    """Elementwise Mish via a tiled, lane-dense Pallas kernel (any shape)."""
    orig_shape = x.shape
    dtype = x.dtype
    itemsize = jnp.dtype(dtype).itemsize
    # Min second-to-last tile: 8 for 4-byte, 16 for 2-byte, 32 for 1-byte.
    sub = max(1, 32 // itemsize)

    n = x.size
    flat = x.reshape(-1)

    lane = _pick_lane_width(n)
    n_pad = 0
    if lane is None:
        # Ragged tail: pad only up to one 128-lane row (tiny), not a full block.
        lane = 128
        n_pad = (-n) % lane
        flat = jnp.concatenate([flat, jnp.zeros((n_pad,), dtype=dtype)])
    rows = (n + n_pad) // lane

    # Target ~2 MiB blocks: in+out double-buffered = 8 MiB of VMEM, safe on
    # v7x (64 MiB VMEM / 32 MiB scoped) as well as v5e/v6e, while amortizing
    # per-grid-step overhead and leaving many blocks for both v7x TensorCores.
    target_block_bytes = 2 * 1024 * 1024
    block_rows = max(sub, target_block_bytes // (lane * itemsize))
    if block_rows >= rows:
        block_rows = rows                      # single full-extent block
    else:
        block_rows = (block_rows // sub) * sub  # keep (8,128)-aligned

    grid = (pl.cdiv(rows, block_rows),)        # partial last block is masked

    x2d = flat.reshape(rows, lane)             # free reshape (contiguous)
    out2d = pl.pallas_call(
        _mish_kernel,
        out_shape=jax.ShapeDtypeStruct((rows, lane), dtype),
        grid_spec=pltpu.PrefetchScalarGridSpec(
            num_scalar_prefetch=0,
            grid=grid,
            in_specs=[pl.BlockSpec((block_rows, lane), lambda i: (i, 0))],
            out_specs=pl.BlockSpec((block_rows, lane), lambda i: (i, 0)),
        ),
        compiler_params=pltpu.CompilerParams(
            dimension_semantics=("parallel",),
            vmem_limit_bytes=32 * 1024 * 1024,  # headroom; safe on v5e/v6e/v7x
        ),
        cost_estimate=pl.CostEstimate(
            flops=5 * n,
            transcendentals=n,
            bytes_accessed=2 * n * itemsize,
        ),
    )(x2d)

    out_flat = out2d.reshape(-1)
    if n_pad:
        out_flat = out_flat[:n]
    return out_flat.reshape(orig_shape)


def mish_reference(x: jax.Array) -> jax.Array:
    # Pure-JAX reference matching torch: x * tanh(softplus(x)), threshold=20.
    sp = jnp.where(x > 20.0, x, jnp.log1p(jnp.exp(jnp.minimum(x, 20.0))))
    return x * jnp.tanh(sp)


if __name__ == "__main__":
    key = jax.random.PRNGKey(0)

    # NCHW input, consistent with how Mish is used inside conv blocks.
    x = jax.random.normal(key, (2, 4, 16, 16), dtype=jnp.float32) * 3.0
    y = jax.block_until_ready(mish(x))
    y_ref = mish_reference(x)
    assert y.shape == x.shape and y.dtype == x.dtype
    assert jnp.allclose(y, y_ref, atol=1e-5, rtol=1e-5)

    # Ragged size (numel not a multiple of 128) exercises the padded fallback.
    x2 = jax.random.normal(jax.random.PRNGKey(1), (2, 3, 5, 7), dtype=jnp.float32) * 3.0
    y2 = jax.block_until_ready(mish(x2))
    assert y2.shape == x2.shape and y2.dtype == x2.dtype
    assert jnp.allclose(y2, mish_reference(x2), atol=1e-5, rtol=1e-5)

    print("KERNEL_OK")
</pallas_src>

<mosaic_0001>
module attributes {stable_mosaic.version = 11 : i64} {
  func.func @_mish_kernel(%arg0: i32, %arg1: memref<1x2048xf32, #tpu.memory_space<vmem>>, %arg2: memref<1x2048xf32, #tpu.memory_space<vmem>>) attributes {dimension_semantics = [#tpu.dimension_semantics<parallel>], iteration_bounds = array<i64: 1>, scalar_prefetch = 0 : i64, scratch_operands = 0 : i64, tpu.core_type = #tpu.core_type<tc>, window_params = [{transform_indices = @transform_0, window_bounds = array<i64: 1, 2048>}, {transform_indices = @transform_1, window_bounds = array<i64: 1, 2048>}]} {
    %c0 = arith.constant 0 : index
    %c0_0 = arith.constant 0 : index
    %0 = vector.load %arg1[%c0, %c0_0] : memref<1x2048xf32, #tpu.memory_space<vmem>>, vector<1x2048xf32>
    %cst = arith.constant 2.000000e+01 : f32
    %1 = vector.broadcast %cst : f32 to vector<1x2048xf32>
    %2 = arith.minimumf %0, %1 : vector<1x2048xf32>
    %3 = math.exp %2 : vector<1x2048xf32>
    %cst_1 = arith.constant 2.000000e+00 : f32
    %4 = vector.broadcast %cst_1 : f32 to vector<1x2048xf32>
    %5 = arith.addf %3, %4 : vector<1x2048xf32>
    %6 = arith.mulf %3, %5 : vector<1x2048xf32>
    %7 = arith.mulf %0, %6 : vector<1x2048xf32>
    %cst_2 = arith.constant 2.000000e+00 : f32
    %8 = vector.broadcast %cst_2 : f32 to vector<1x2048xf32>
    %9 = arith.addf %6, %8 : vector<1x2048xf32>
    %10 = tpu.reciprocal %9 : vector<1x2048xf32> -> vector<1x2048xf32>
    %11 = arith.mulf %7, %10 : vector<1x2048xf32>
    %c0_3 = arith.constant 0 : index
    %c0_4 = arith.constant 0 : index
    %12 = vector.load %arg2[%c0_3, %c0_4] : memref<1x2048xf32, #tpu.memory_space<vmem>>, vector<1x2048xf32>
    tpu.vector_store %arg2[%c0_3, %c0_4], %11 {strides = array<i32>} : memref<1x2048xf32, #tpu.memory_space<vmem>>, vector<1x2048xf32>,
    return
  }
  func.func @transform_0(%arg0: i32) -> (i32, i32) {
    %c0_i32 = arith.constant 0 : i32
    %c0_i32_0 = arith.constant 0 : i32
    return %arg0, %c0_i32 : i32, i32
  }
  func.func @transform_1(%arg0: i32) -> (i32, i32) {
    %c0_i32 = arith.constant 0 : i32
    %c0_i32_0 = arith.constant 0 : i32
    return %arg0, %c0_i32 : i32, i32
  }
}

</mosaic_0001>

<bundles_post_ra>
// kernel: tpu_custom_call.1
= control target key start
LH: loop header
LB: loop body
LE: loop exit
PB: predicated region body
PF: predicated region fallthrough
CT: control target
= control target key end

     0   :  { %6 = vsyncpa [#allocation3], 0  ;;  %s152_s0 = inlined_call_operand.hbm [shape: f32[1,2048], index: 0, kind: input, shape index: {}]   ;;  %s153_s1 = inlined_call_operand.hbm [shape: f32[1,2048], index: 1, kind: output, shape index: {}]  }
   0x1   :  { %7 = vsyncpa [#allocation4], 0  ;;  %s116_s6 = smov [#allocation2]   ;;  %s68_s10 = scalar_lea.hbm %s152_s0, 256 }
   0x2   :  { %s14_s7 = sshll.u32 %s116_s6, 4  ;;  %p69_p0 = scmp.ne.s32.totalorder %s152_s0, %s68_s10  ;;  %s15_s7 = int_to_ptr.vmem [resolvable:$true] %s14_s7 }
   0x3   :  { %p72_p1 = scmp.lt.u32.totalorder %s68_s10, %s152_s0 }
   0x5   :  { %p74_p2 = pnand %p72_p1, %p69_p0 }
   0x7   :  { %77 = shalt.err (!%p74_p2)
}
   0x8   :  { %s78_s15 = scalar_lea.vmem %s15_s7, 256  ;;  %p83_p4 = scmp.lt.s32.totalorder %s15_s7, %s15_s7 }
   0x9   :  { %p79_p3 = scmp.ne.s32.totalorder %s15_s7, %s78_s15  ;;  %p84_p5 = scmp.lt.s32.totalorder %s78_s15, %s78_s15 }
   0xb   :  { %p85_p6 = por %p84_p5, %p83_p4 }
   0xd   :  { %p86_p7 = pnand %p85_p6, %p79_p3 }
   0xf   :  { %89 = shalt.err (!%p86_p7)
}
  0x10   :  { %17 = dma.hbm_to_vmem [thread:$0]  %s152_s0, 256, %s15_s7, [#allocation3]  }
  0x11   :  { %112 = dma.done.wait [#allocation3], 256  }
  0x12   :  { %113 = vsyncadd [#allocation3], 4294967040  ;;  %v21_v0 = vld [vmem:[#allocation2] sm:$0xff]  ;;  %v22_v1 = vld [vmem:[#allocation2 + $0x8] sm:$0xff]  ;;  %s117_s0 = smov [#allocation5]  }
  0x13   :  { %v23_v2 = vmin.f32 %v21_v0, 20.0  ;;  %v24_v3 = vmin.f32 %v22_v1, 20.0  ;;  %s49_s18 = sshll.u32 %s117_s0, 4  ;;  %s50_s18 = int_to_ptr.vmem [resolvable:$true] %s49_s18 }
  0x14   :  { %s90_s19 = scalar_lea.vmem %s50_s18, 256  ;;  %p95_p9 = scmp.lt.s32.totalorder %s50_s18, %s50_s18 }
  0x15   :  { %v25_v4 = vmul.f32 1.442695, %v23_v2  ;;  %v27_v5 = vmul.f32 1.442695, %v24_v3  ;;  %p91_p8 = scmp.ne.s32.totalorder %s50_s18, %s90_s19  ;;  %p96_p10 = scmp.lt.s32.totalorder %s90_s19, %s90_s19 }
  0x17   :  { %60 = vpow2.f32 %v25_v4  ;;  %p97_p11 = por %p96_p10, %p95_p9 }
  0x18   :  { %62 = vpow2.f32 %v27_v5 }
  0x19   :  { %p98_p12 = pnand %p97_p11, %p91_p8 }
  0x21   :  { %v61_v6 = vpop.eup %60 }
  0x22   :  { %v63_v7 = vpop.eup %62  ;;  %v29_v8 = vadd.f32 2.0, %v61_v6 }
  0x23   :  { %v30_v9 = vadd.f32 2.0, %v63_v7 }
  0x24   :  { %v31_v10 = vmul.f32 %v61_v6, %v29_v8 }
  0x25   :  { %v32_v11 = vmul.f32 %v63_v7, %v30_v9 }
  0x26   :  { %v35_v12 = vadd.f32 2.0, %v31_v10  ;;  %v33_v14 = vmul.f32 %v31_v10, %v21_v0 }
  0x27   :  { %v36_v13 = vadd.f32 2.0, %v32_v11  ;;  %v34_v15 = vmul.f32 %v32_v11, %v22_v1 }
  0x28   :  { %64 = vrcp.f32 %v35_v12 }
  0x29   :  { %66 = vrcp.f32 %v36_v13 }
  0x32   :  { %v65_v16 = vpop.eup %64 }
  0x33   :  { %v67_v17 = vpop.eup %66  ;;  %v39_v18 = vmul.f32 %v65_v16, %v33_v14 }
  0x34   :  { %v40_v19 = vmul.f32 %v67_v17, %v34_v15 }
  0x35   :  { %41 = vst [vmem:[#allocation5] sm:$0xff] %v39_v18 }
  0x36   :  { %42 = vst [vmem:[#allocation5 + $0x8] sm:$0xff] %v40_v19 }
  0x37   :  { %101 = shalt.err (!%p98_p12)
}
  0x38   :  { %s102_s22 = scalar_lea.hbm %s153_s1, 256 }
  0x39   :  { %p103_p13 = scmp.ne.s32.totalorder %s153_s1, %s102_s22  ;;  %p106_p0 = scmp.lt.u32.totalorder %s102_s22, %s153_s1 }
  0x3b   :  { %p108_p1 = pnand %p106_p0, %p103_p13 }
  0x3d   :  { %111 = shalt.err (!%p108_p1)
}
  0x3e   :  { %52 = dma.vmem_to_hbm [thread:$0]  %s50_s18, 256, %s153_s1, [#allocation4]  }
  0x3f   :  { %114 = dma.done.wait [#allocation4], 256  }
  0x40   :  { %115 = vsyncadd [#allocation4], 4294967040 }
  0x41   :  { %56 = vsyncpa [#allocation3], 1 }
  0x42   :  { %57 = vsyncpa [#allocation4], 1 }

</bundles_post_ra>
